<compile_context>
chip_gen: v5e
topology: v5e:2x2
jax: 0.10.0
libtpu: 0.0.40
codegen_flags: <defaults>
</compile_context>

<pallas_src>
import jax
import jax.numpy as jnp
from jax.experimental import pallas as pl
from jax.experimental.pallas import tpu as pltpu

HIDDEN = 128  # backbone output channels (fixed by the module: Conv1d(128, input_dim, 1))


def superhead1_kernel(x_ref, w1a_ref, w2_ref, b2_ref, o_ref):
    # x_ref : (TB, C_in, TILE_L)     f32  current (batch-tile, L-tile) block, NCL layout
    # w1a_ref: (HIDDEN, C_in + 1)    bf16 frozen backbone stand-in weight with b1 folded in
    # w2_ref : (C_out, HIDDEN)       bf16 learnable Conv1d(128, input_dim, 1) weight
    # b2_ref : (C_out, 1)            f32
    # o_ref  : (TB, C_out, TILE_L)   f32
    tb, _, tile_l = x_ref.shape

    # Hoist the (tiny, revisited) weight/bias loads out of the batch loop.
    w1a = w1a_ref[...]
    w2 = w2_ref[...]
    b2 = b2_ref[...]
    ones = jnp.ones((1, tile_l), jnp.float32)

    for b in range(tb):  # TB is a small static block dim
        # Append a ones row so b1 is applied inside the MXU accumulator.
        x_aug = jnp.concatenate([x_ref[b], ones], axis=0).astype(jnp.bfloat16)  # (C_in+1, TILE_L)

        # frozen backbone stand-in: pointwise conv (+ folded bias) + ReLU
        h = jnp.dot(w1a, x_aug, preferred_element_type=jnp.float32)             # (128, TILE_L) f32
        h = jnp.maximum(h, 0.0).astype(jnp.bfloat16)                            # bf16 feed to 2nd MXU

        # learnable layer: Conv1d(128, input_dim, kernel_size=1) == channel matmul
        y = jnp.dot(w2, h, preferred_element_type=jnp.float32)                  # (C_out, TILE_L) f32
        o_ref[b] = (y + b2).astype(o_ref.dtype)


def _choose_tile_l(L, max_tile_l):
    """Largest lane-dense tile (multiple of 128, >= 128) dividing L, capped for VMEM."""
    if L % 128 != 0:
        # Full-extent block (satisfies the (8,128) rule by equalling the array dim).
        return L
    if L <= 128:
        return L
    tile = max(128, (min(L, max_tile_l) // 128) * 128)
    while L % tile != 0:
        tile -= 128
    return tile


def _choose_batch_tile(B, num_l_tiles, tile_l, max_h_bytes=12 * 2**20):
    """Block TB batch rows per grid step when each L-tile step is tiny.

    Grows TB (a divisor of B) while:
      * at least 2 grid steps remain (megacore / v7x 2-TC sharding) whenever the
        un-blocked grid had >= 2 steps,
      * the per-step f32+bf16 hidden-activation footprint stays under max_h_bytes
        (safe even for v5e's 16 MiB scoped-VMEM default),
      * each step is not already moving plenty of work.
    """
    tb = 1
    for cand in range(2, B + 1):
        if B % cand != 0:
            continue
        if tb * tile_l >= 16384:
            break  # per-step work already large enough
        steps = (B // cand) * num_l_tiles
        if steps < 2 and B * num_l_tiles >= 2:
            continue
        if cand * HIDDEN * tile_l * 6 > max_h_bytes:
            continue
        tb = cand
    return tb


def superhead1_forward(x_ncl, w1, b1, w2, b2, *, max_tile_l=8192):
    """x_ncl: (B, C_in, L) float32 (PyTorch NCL layout).  Returns (B, C_out, L) float32."""
    B, C_in, L = x_ncl.shape
    C_out = w2.shape[0]

    # Ragged large L: pad to a multiple of 128 so we can tile instead of forcing
    # one huge full-extent block (which could exceed VMEM, esp. on v7x).
    L_pad, x_in = L, x_ncl
    if L % 128 != 0 and L > max_tile_l:
        L_pad = ((L + 127) // 128) * 128
        x_in = jnp.pad(x_ncl, ((0, 0), (0, 0), (0, L_pad - L)))

    tile_l = _choose_tile_l(L_pad, max_tile_l)
    num_l_tiles = L_pad // tile_l
    tb = _choose_batch_tile(B, num_l_tiles, tile_l)

    # Conv1d k=1 weights have shape (out, in, 1); keep them (out, in) so the
    # channel contraction happens with L on the lane axis.  b1 is folded into
    # w1 as an extra column (paired with the in-kernel ones row).  Weights go
    # bf16 (MXU feed); b2 stays f32 as a (C_out, 1) lane-broadcast column.
    w1_aug = jnp.concatenate([w1[:, :, 0], b1.reshape(HIDDEN, 1)],
                             axis=1).astype(jnp.bfloat16)          # (HIDDEN, C_in+1)
    w2_m = w2[:, :, 0].astype(jnp.bfloat16)                        # (C_out, HIDDEN)
    b2_c = b2.reshape(C_out, 1).astype(jnp.float32)                # (C_out, 1)

    # Explicit VMEM budget: double-buffered x/y tiles + f32 & bf16 h + weights.
    est = (2 * tb * C_in * tile_l * 4          # x tile, double-buffered, f32
           + 2 * tb * C_out * tile_l * 4       # y tile, double-buffered, f32
           + tb * HIDDEN * tile_l * (4 + 2)    # h: f32 accumulator + bf16 copy
           + (HIDDEN * (C_in + 1) + C_out * HIDDEN) * 2 + (C_out + HIDDEN) * 4)
    vmem_limit = int(min(max(2 * est, 32 * 2**20), 64 * 2**20))

    out = pl.pallas_call(
        superhead1_kernel,
        out_shape=jax.ShapeDtypeStruct((B, C_out, L_pad), x_ncl.dtype),
        grid_spec=pltpu.PrefetchScalarGridSpec(
            num_scalar_prefetch=0,
            grid=(B // tb, num_l_tiles),
            in_specs=[
                pl.BlockSpec((tb, C_in, tile_l), lambda bi, lt: (bi, 0, lt)),
                pl.BlockSpec((HIDDEN, C_in + 1), lambda bi, lt: (0, 0)),
                pl.BlockSpec((C_out, HIDDEN), lambda bi, lt: (0, 0)),
                pl.BlockSpec((C_out, 1), lambda bi, lt: (0, 0)),
            ],
            out_specs=pl.BlockSpec((tb, C_out, tile_l), lambda bi, lt: (bi, 0, lt)),
        ),
        compiler_params=pltpu.CompilerParams(
            dimension_semantics=("parallel", "parallel"),
            vmem_limit_bytes=vmem_limit),
    )(x_in, w1_aug, w2_m, b2_c)

    if L_pad != L:
        out = out[:, :, :L]
    return out


def reference_forward(x_ncl, w1, b1, w2, b2):
    """Pure-JAX f32 reference of the same forward pass (NCL in, NCL out)."""
    h = jnp.einsum("bcl,hc->bhl", x_ncl, w1[:, :, 0]) + b1[None, :, None]
    h = jnp.maximum(h, 0.0)
    y = jnp.einsum("bhl,oh->bol", h, w2[:, :, 0]) + b2[None, :, None]
    return y


if __name__ == "__main__":
    # Small, deterministic shapes consistent with the module:
    #   input_dim (== learnable-layer out channels) = 8
    #   backbone input channels = 4, sequence length = 256, batch = 2
    B, C_in, L = 2, 4, 256
    input_dim = 8

    key = jax.random.PRNGKey(0)
    k_x, k_w1, k_b1, k_w2, k_b2 = jax.random.split(key, 5)

    x = jax.random.normal(k_x, (B, C_in, L), dtype=jnp.float32)

    # Frozen backbone stand-in params: Conv1d(C_in, 128, k=1)
    w1 = jax.random.normal(k_w1, (HIDDEN, C_in, 1), dtype=jnp.float32) * 0.1
    b1 = jax.random.normal(k_b1, (HIDDEN,), dtype=jnp.float32) * 0.1

    # Learnable layer params: Conv1d(128, input_dim, k=1)
    w2 = jax.random.normal(k_w2, (input_dim, HIDDEN, 1), dtype=jnp.float32) * 0.1
    b2 = jax.random.normal(k_b2, (input_dim,), dtype=jnp.float32) * 0.1

    ref = reference_forward(x, w1, b1, w2, b2)

    # Default (large-tile) path: single L-tile per batch row, grid = (B, 1).
    out = jax.block_until_ready(superhead1_forward(x, w1, b1, w2, b2))
    assert out.shape == (B, input_dim, L), out.shape
    # Tolerance loosened for bf16 MXU operands (f32 accumulation).
    assert jnp.allclose(out, ref, atol=2e-2, rtol=2e-2), "mismatch vs reference (default tiles)"

    # Also exercise the multi-L-tile path (grid = (B, L // 128)).
    out_t = jax.block_until_ready(superhead1_forward(x, w1, b1, w2, b2, max_tile_l=128))
    assert jnp.allclose(out_t, ref, atol=2e-2, rtol=2e-2), "mismatch vs reference (tiled)"

    print("KERNEL_OK")
</pallas_src>

<mosaic_0001>
module attributes {stable_mosaic.version = 11 : i64} {
  func.func @superhead1_kernel(%arg0: i32, %arg1: i32, %arg2: memref<1x4x256xf32, #tpu.memory_space<vmem>>, %arg3: memref<128x5xbf16, #tpu.memory_space<vmem>>, %arg4: memref<8x128xbf16, #tpu.memory_space<vmem>>, %arg5: memref<8x1xf32, #tpu.memory_space<vmem>>, %arg6: memref<1x8x256xf32, #tpu.memory_space<vmem>>) attributes {dimension_semantics = [#tpu.dimension_semantics<parallel>, #tpu.dimension_semantics<parallel>], iteration_bounds = array<i64: 2, 1>, scalar_prefetch = 0 : i64, scratch_operands = 0 : i64, tpu.core_type = #tpu.core_type<tc>, window_params = [{transform_indices = @transform_0, window_bounds = array<i64: 1, 4, 256>}, {pipeline_mode = #tpu.pipeline_mode<synchronous>, transform_indices = @transform_1, window_bounds = array<i64: 128, 5>}, {pipeline_mode = #tpu.pipeline_mode<synchronous>, transform_indices = @transform_2, window_bounds = array<i64: 8, 128>}, {pipeline_mode = #tpu.pipeline_mode<synchronous>, transform_indices = @transform_3, window_bounds = array<i64: 8, 1>}, {transform_indices = @transform_4, window_bounds = array<i64: 1, 8, 256>}]} {
    %c0 = arith.constant 0 : index
    %c0_0 = arith.constant 0 : index
    %0 = vector.load %arg3[%c0, %c0_0] : memref<128x5xbf16, #tpu.memory_space<vmem>>, vector<128x5xbf16>
    %c0_1 = arith.constant 0 : index
    %c0_2 = arith.constant 0 : index
    %1 = vector.load %arg4[%c0_1, %c0_2] : memref<8x128xbf16, #tpu.memory_space<vmem>>, vector<8x128xbf16>
    %c0_3 = arith.constant 0 : index
    %c0_4 = arith.constant 0 : index
    %2 = vector.load %arg5[%c0_3, %c0_4] : memref<8x1xf32, #tpu.memory_space<vmem>>, vector<8x1xf32>
    %cst = arith.constant 1.000000e+00 : f32
    %3 = vector.broadcast %cst : f32 to vector<1x256xf32>
    %c0_5 = arith.constant 0 : index
    %c0_6 = arith.constant 0 : index
    %c0_7 = arith.constant 0 : index
    %4 = vector.load %arg2[%c0_5, %c0_6, %c0_7] : memref<1x4x256xf32, #tpu.memory_space<vmem>>, vector<1x4x256xf32>
    %5 = vector.shape_cast %4 : vector<1x4x256xf32> to vector<4x256xf32>
    %6 = tpu.concatenate %5, %3 in 0 : vector<4x256xf32>, vector<1x256xf32> -> vector<5x256xf32>
    %7 = arith.truncf %6 : vector<5x256xf32> to vector<5x256xbf16>
    %cst_8 = arith.constant dense<0.000000e+00> : vector<128x256xf32>
    %8 = tpu.matmul %0, %7, %cst_8 {dimension_numbers = #tpu.dot_dimension_numbers<[1], [0], [0], [1], [0, 0, 1, 1], [], []>} : vector<128x5xbf16>, vector<5x256xbf16>, vector<128x256xf32> -> vector<128x256xf32>
    %cst_9 = arith.constant 0.000000e+00 : f32
    %9 = vector.broadcast %cst_9 : f32 to vector<128x256xf32>
    %10 = arith.maximumf %8, %9 : vector<128x256xf32>
    %11 = arith.truncf %10 : vector<128x256xf32> to vector<128x256xbf16>
    %cst_10 = arith.constant dense<0.000000e+00> : vector<8x256xf32>
    %12 = tpu.matmul %1, %11, %cst_10 {dimension_numbers = #tpu.dot_dimension_numbers<[1], [0], [0], [1], [0, 0, 1, 1], [], []>} : vector<8x128xbf16>, vector<128x256xbf16>, vector<8x256xf32> -> vector<8x256xf32>
    %13 = vector.broadcast %2 : vector<8x1xf32> to vector<8x256xf32>
    %14 = arith.addf %12, %13 : vector<8x256xf32>
    %c0_11 = arith.constant 0 : index
    %c0_12 = arith.constant 0 : index
    %c0_13 = arith.constant 0 : index
    %15 = vector.load %arg6[%c0_11, %c0_12, %c0_13] : memref<1x8x256xf32, #tpu.memory_space<vmem>>, vector<1x8x256xf32>
    %16 = vector.shape_cast %15 : vector<1x8x256xf32> to vector<8x256xf32>
    %17 = vector.shape_cast %14 : vector<8x256xf32> to vector<1x8x256xf32>
    tpu.vector_store %arg6[%c0_11, %c0_12, %c0_13], %17 {strides = array<i32>} : memref<1x8x256xf32, #tpu.memory_space<vmem>>, vector<1x8x256xf32>,
    return
  }
  func.func @transform_0(%arg0: i32, %arg1: i32) -> (i32, i32, i32) {
    %c0_i32 = arith.constant 0 : i32
    %c0_i32_0 = arith.constant 0 : i32
    return %arg0, %c0_i32, %arg1 : i32, i32, i32
  }
  func.func @transform_1(%arg0: i32, %arg1: i32) -> (i32, i32) {
    %c0_i32 = arith.constant 0 : i32
    %c0_i32_0 = arith.constant 0 : i32
    %c0_i32_1 = arith.constant 0 : i32
    return %c0_i32, %c0_i32_0 : i32, i32
  }
  func.func @transform_2(%arg0: i32, %arg1: i32) -> (i32, i32) {
    %c0_i32 = arith.constant 0 : i32
    %c0_i32_0 = arith.constant 0 : i32
    %c0_i32_1 = arith.constant 0 : i32
    return %c0_i32, %c0_i32_0 : i32, i32
  }
  func.func @transform_3(%arg0: i32, %arg1: i32) -> (i32, i32) {
    %c0_i32 = arith.constant 0 : i32
    %c0_i32_0 = arith.constant 0 : i32
    %c0_i32_1 = arith.constant 0 : i32
    return %c0_i32, %c0_i32_0 : i32, i32
  }
  func.func @transform_4(%arg0: i32, %arg1: i32) -> (i32, i32, i32) {
    %c0_i32 = arith.constant 0 : i32
    %c0_i32_0 = arith.constant 0 : i32
    return %arg0, %c0_i32, %arg1 : i32, i32, i32
  }
}

</mosaic_0001>

<bundles_post_ra>
// kernel: tpu_custom_call.1
= control target key start
LH: loop header
LB: loop body
LE: loop exit
PB: predicated region body
PF: predicated region fallthrough
CT: control target
= control target key end

     0   :  { %9 = vsyncpa [#allocation3], 0  ;;  %s1015_s0 = inlined_call_operand.vmem [shape: f32[2,4,256], index: 0, kind: input, shape index: {}]   ;;  %s1016_s1 = inlined_call_operand.vmem [shape: bf16[128,5], index: 1, kind: input, shape index: {}]   ;;  %s1017_s2 = inlined_call_operand.vmem [shape: bf16[8,128], index: 2, kind: input, shape index: {}]   ;;  %s1018_s3 = inlined_call_operand.vmem [shape: f32[8,1], index: 3, kind: input, shape index: {}]   ;;  %s1019_s4 = inlined_call_operand.hbm [shape: f32[2,8,256], index: 4, kind: output, shape index: {}]  }
   0x1   :  { %11 = vsyncpa [#allocation3 + $0x1], 0  ;;  %s845_s15 = smov 0   ;;  %s847_s16 = smov 0  }
   0x2   :  { %s849_s17 = smov 0   ;;  %s851_s18 = smov 0  }
   0x3   :  { %s853_s19 = smov 0   ;;  %s855_s20 = smov 0  }
   0x4 LB: > { %s607_s21 = sadd.s32 4294967295, %s816_s20   ;;  %s608_s22 = sadd.s32 4294967294, %s816_s20   ;;  %s816_s20 = sphi %s855_s20, %s17_s20   ;;  %s812_s19 = sphi %s853_s19, %s1026_s19   ;;  %s808_s18 = sphi %s851_s18, %s1025_s18   ;;  %s804_s17 = sphi %s849_s17, %s1024_s17   ;;  %s800_s16 = sphi %s847_s16, %s1023_s16   ;;  %s796_s15 = sphi %s845_s15, %s1022_s15  }
   0x5   : > { %s29_s23 = sadd.s32 1, %s812_s19  ;;  %s129_s24 = sadd.s32 1, %s804_s17 }
   0x6   : > { %p31_p0 = scmp.ge.s32.totalorder %s29_s23, 2  ;;  %p139_p1 = scmp.ne.s32.totalorder %s804_s17, %s800_s16 }
   0x7   : > { %p140_p2 = scmp.eq.s32.totalorder %s607_s21, 1  ;;  %p145_p3 = scmp.ne.s32.totalorder %s800_s16, %s796_s15 }
   0x8   : > { %s1028_s23 = smov (%p31_p0, %s29_s23), 0  ;;  %p146_p5 = scmp.eq.s32.totalorder %s608_s22, 1 }
   0x9   : > { %p885_p4 = por %p140_p2, %p139_p1  ;;  %s124_s26 = ssub.s32 %s812_s19, %s1028_s23 }
   0xa   : > { %p611_p6 = scmp.ge.s32.totalorder %s816_s20, 1  ;;  %p127_p7 = scmp.eq.s32.totalorder %s124_s26, 0 }
   0xb   : > { %p892_p8 = por %p146_p5, %p145_p3  ;;  %p186_p9 = scmp.lt.s32.totalorder %s816_s20, 3 }
   0xc   : > { %s898_s28 = scalar_select %p127_p7, %s804_s17, %s129_s24  }
   0xd   : > { %p187_p10 = pnand %p611_p6, %p186_p9 }
   0xe   : > { %p217_p11 = scmp.lt.s32.totalorder (!%p187_p10), %s808_s18, 1  ;;  %s213_s12 = sand.u32 (!%p187_p10), 1, %s800_s16  }
   0xf   : > { %190 = sbr.rel (%p187_p10) target bundleno = 403 (0x193), region = 36  ;;  %s677_s13 = sshll.u32 (!%p187_p10), %s808_s18, 4 }
  0x10   : > { %s612_s14 = sshll.u32 (!%p187_p10), %s213_s12, 4  ;;  %s526_s24 = scalar_lea.hbm (!%p187_p10), %s1019_s4, %s677_s13 }
  0x11   : > { %s215_s26 = scalar_lea.vmem (!%p187_p10), [#allocation2], %s612_s14  ;;  %s513_s5 = scalar_lea.sflag (!%p187_p10), [#allocation3], %s213_s12 }
  0x12   : > { %s758_s9 = scalar_lea.hbm (!%p187_p10), %s1019_s4, 32 }
  0x14   : > { %s218_s29 = scalar_select %p217_p11, %s808_s18, 1  ;;  %vm323_vm0 = vcmask 1041408   ;;  %vm253_vm1 = vcmask 1043456   ;;  %vm324_vm2 = vcmask 1042432   ;;  %v818_v1 = vmov 65535   ;;  %v669_v12 = vld [vmem:[%s1016_s1] sm:$0xff] }
  0x15   : > { %v325_v2 = vsel %vm323_vm0, 4294967295, %v818_v1  ;;  %v674_v13 = vld [vmem:[%s1016_s1 + $0x28] sm:$0xff]  ;;  %vm298_vm3 = vcmask 39936   ;;  %v675_v15 = vld [vmem:[%s1016_s1 + $0x30] sm:$0xff]  ;;  %v676_v17 = vld [vmem:[%s1016_s1 + $0x38] sm:$0xff] }
  0x16   : > { %s668_s30 = sshll.u32 %s218_s29, 3  ;;  %v326_v6 = vsel %vm324_vm2, %v325_v2, 0  ;;  %v670_v14 = vld [vmem:[%s1016_s1 + $0x8] sm:$0xff]  ;;  %v671_v16 = vld [vmem:[%s1016_s1 + $0x10] sm:$0xff]  ;;  %v672_v18 = vld [vmem:[%s1016_s1 + $0x18] sm:$0xff]  ;;  %s528_s29 = sshll.u32 %s215_s26, 4  ;;  %s529_s29 = int_to_ptr.vmem [resolvable:$true] %s528_s29 }
  0x17   : > { %s224_s7 = scalar_lea.vmem %s1015_s0, %s668_s30  ;;  %v673_v19 = vld [vmem:[%s1016_s1 + $0x20] sm:$0xff]  ;;  %s530_s30 = sshll.u32 %s526_s24, 4  ;;  %s531_s30 = int_to_ptr.hbm [resolvable:$true] %s530_s30 }
  0x18   : > { %v246_v0 = vld [vmem:[%s224_s7] sm:$0xff]  ;;  %s752_s18 = sshra.s32 %s531_s30, 4  ;;  %s753_s18 = int_to_ptr.hbm [resolvable:$true] %s752_s18 }
  0x19   : > { %248 = vst [vmem:[#allocation1] ss:$2 sm:$0xff] %v246_v0  ;;  %s754_s6 = scalar_lea.hbm %s753_s18, 16  ;;  %p759_p1 = scmp.lt.s32.totalorder %s753_s18, %s1019_s4 }
  0x1a   : > { %p755_p12 = scmp.ne.s32.totalorder %s753_s18, %s754_s6  ;;  %p760_p2 = scmp.lt.s32.totalorder %s758_s9, %s754_s6 }
  0x1c   : > { %p756_p13 = pnand %p755_p12, %p885_p4  ;;  %p761_p3 = por %p760_p2, %p759_p1 }
  0x1e   : > { %p757_p0 = pneg %p756_p13 }
  0x20   : > { %v249_v3 = vld.sshfl [vmem:[#allocation1] sm:$0xff pattern:$0x75316420]  ;;  %v250_v4 = vld.sshfl [vmem:[#allocation1 + $0x8] sm:$0xff pattern:$0x75316420]  ;;  %p762_p5 = pnand %p761_p3, %p757_p0 }
  0x21   : > { %v254_v5 = vsel %vm253_vm1, %v249_v3, 1.0  ;;  %v255_v7 = vsel %vm253_vm1, %v250_v4, 1.0 }
  0x22   : > { %v256_v8 = vpack.c.bf16 %v254_v5, %v254_v5  ;;  %v257_v9 = vpack.c.bf16 %v255_v7, %v255_v7 }
  0x24   : > { %v328_v10 = vand.u32 %v326_v6, %v256_v8  ;;  %v331_v11 = vand.u32 %v326_v6, %v257_v9 }
  0x26   : > { %340 = vmatpush.bf16.msra.mxu0 %v328_v10  ;;  %678 = vmatpush.bf16.msra.mxu2 %v328_v10  ;;  %v245_v10 = vld [vmem:[%s1018_s3] sm:$0xff] }
  0x27   : > { %389 = vmatpush.bf16.msra.mxu1 %v331_v11  ;;  %679 = vmatpush.bf16.msra.mxu3 %v331_v11  ;;  %v819_v11 = vmov 0  }
  0x28   : > { %737 = vset.pattern.permute.xlu0 %v819_v11 }
  0x29   : > { %647 = vmatmul.msk.bf16.vlgmr.msra.gmra.mxu0 %vm298_vm3, %v669_v12  ;;  %652 = vmatmul.msk.bf16.vlgmr.msra.gmra.mxu2 %vm298_vm3, %v674_v13 }
  0x2a   : > { %655 = vmatmul.msk.bf16.vlgmr.msra.gmra.mxu1 %vm298_vm3, %v669_v12  ;;  %660 = vmatmul.msk.bf16.vlgmr.msra.gmra.mxu3 %vm298_vm3, %v674_v13 }
  0x2b   : > { %481 = vperm.xlu0 %737, %v245_v10  }
  0x39   : > { %648 = vmatmul.msk.bf16.gmra.mxu0 %vm298_vm3, %v670_v14  ;;  %653 = vmatmul.msk.bf16.gmra.mxu2 %vm298_vm3, %v675_v15 }
  0x3a   : > { %656 = vmatmul.msk.bf16.gmra.mxu1 %vm298_vm3, %v670_v14  ;;  %661 = vmatmul.msk.bf16.gmra.mxu3 %vm298_vm3, %v675_v15 }
  0x49   : > { %649 = vmatmul.msk.bf16.gmra.mxu0 %vm298_vm3, %v671_v16  ;;  %654 = vmatmul.msk.bf16.gmra.mxu2 %vm298_vm3, %v676_v17 }
  0x4a   : > { %657 = vmatmul.msk.bf16.gmra.mxu1 %vm298_vm3, %v671_v16  ;;  %662 = vmatmul.msk.bf16.gmra.mxu3 %vm298_vm3, %v676_v17 }
  0x59   : > { %650 = vmatmul.msk.bf16.gmra.mxu0 %vm298_vm3, %v672_v18 }
  0x5a   : > { %658 = vmatmul.msk.bf16.gmra.mxu1 %vm298_vm3, %v672_v18 }
  0x69   : > { %651 = vmatmul.msk.bf16.gmra.mxu0 %vm298_vm3, %v673_v19 }
  0x6a   : > { %659 = vmatmul.msk.bf16.gmra.mxu1 %vm298_vm3, %v673_v19 }
  0xa6   : > { %v342_v20 = vpop.f32.mrf.mxu0 }
  0xa7   : > { %v391_v21 = vpop.f32.mrf.mxu1  ;;  %v431_v25 = vmax.f32 %v342_v20, 0.0 }
  0xa8   : > { %v432_v28 = vmax.f32 %v391_v21, 0.0 }
  0xac   : > { %v367_v22 = vpop.f32.mrf.mxu2 }
  0xad   : > { %v416_v23 = vpop.f32.mrf.mxu3  ;;  %v451_v62 = vmax.f32 %v367_v22, 0.0 }
  0xae   : > { %v344_v24 = vpop.f32.mrf.mxu0  ;;  %v452_v1 = vmax.f32 %v416_v23, 0.0 }
  0xaf   : > { %v433_v26 = vmax.f32 %v344_v24, 0.0  ;;  %v393_v27 = vpop.f32.mrf.mxu1 }
  0xb0   : > { %v434_v29 = vmax.f32 %v393_v27, 0.0 }
  0xb1   : > { %v945_v30 = vpack.c.bf16 %v433_v26, %v431_v25 }
  0xb2   : > { %v947_v31 = vpack.c.bf16 %v434_v29, %v432_v28 }
  0xb4   : > { %v369_v32 = vpop.f32.mrf.mxu2 }
  0xb5   : > { %v418_v33 = vpop.f32.mrf.mxu3  ;;  %v453_v63 = vmax.f32 %v369_v32, 0.0 }
  0xb6   : > { %v949_v34 = vpop.f32.mrf.mxu0  ;;  %v454_v2 = vmax.f32 %v418_v33, 0.0 }
  0xb7   : > { %v951_v35 = vpop.f32.mrf.mxu1  ;;  %v473_v6 = vpack.c.bf16 %v453_v63, %v451_v62 }
  0xb8   : > { %v474_v7 = vpack.c.bf16 %v454_v2, %v452_v1 }
  0xbc   : > { %v372_v36 = vpop.f32.mrf.mxu2 }
  0xbd   : > { %v421_v37 = vpop.f32.mrf.mxu3  ;;  %v455_v55 = vmax.f32 %v372_v36, 0.0 }
  0xbe   : > { %v953_v38 = vpop.f32.mrf.mxu0  ;;  %v456_v59 = vmax.f32 %v421_v37, 0.0 }
  0xbf   : > { %v955_v39 = vpop.f32.mrf.mxu1  ;;  %v437_v32 = vmax.f32 %v953_v38, 0.0  ;;  %v244_v38 = vld [vmem:[%s1017_s2] sm:$0xf] }
  0xc0   : > { %v438_v36 = vmax.f32 %v955_v39, 0.0 }
  0xc4   : > { %v374_v40 = vpop.f32.mrf.mxu2 }
  0xc5   : > { %v423_v41 = vpop.f32.mrf.mxu3  ;;  %v457_v56 = vmax.f32 %v374_v40, 0.0  ;;  %v435_v40 = vmax.f32 %v949_v34, 0.0  ;;  %v482_v34 = vpop.permute.xlu0 %481 }
  0xc6   : > { %v957_v42 = vpop.f32.mrf.mxu0  ;;  %v458_v60 = vmax.f32 %v423_v41, 0.0  ;;  %v436_v41 = vmax.f32 %v951_v35, 0.0 }
  0xc7   : > { %v959_v43 = vpop.f32.mrf.mxu1  ;;  %v475_v0 = vpack.c.bf16 %v457_v56, %v455_v55  ;;  %v439_v28 = vmax.f32 %v957_v42, 0.0 }
  0xc8   : > { %v476_v3 = vpack.c.bf16 %v458_v60, %v456_v59  ;;  %v440_v29 = vmax.f32 %v959_v43, 0.0  ;;  %v466_v42 = vpack.c.bf16 %v438_v36, %v436_v41 }
  0xcc   : > { %v377_v44 = vpop.f32.mrf.mxu2 }
  0xcd   : > { %v426_v45 = vpop.f32.mrf.mxu3  ;;  %v459_v48 = vmax.f32 %v377_v44, 0.0  ;;  %v465_v44 = vpack.c.bf16 %v437_v32, %v435_v40 }
  0xce   : > { %v354_v46 = vpop.f32.mrf.mxu0  ;;  %v460_v49 = vmax.f32 %v426_v45, 0.0 }
  0xcf   : > { %v961_v47 = vpop.f32.mrf.mxu1  ;;  %v441_v24 = vmax.f32 %v354_v46, 0.0 }
  0xd0   : > { %v442_v26 = vmax.f32 %v961_v47, 0.0 }
  0xd1   : > { %v467_v33 = vpack.c.bf16 %v441_v24, %v439_v28 }
  0xd2   : > { %v468_v37 = vpack.c.bf16 %v442_v26, %v440_v29 }
  0xd4   : > { %v379_v50 = vpop.f32.mrf.mxu2 }
  0xd5   : > { %v461_v51 = vmax.f32 %v379_v50, 0.0  ;;  %v428_v52 = vpop.f32.mrf.mxu3 }
  0xd6   : > { %v462_v53 = vmax.f32 %v428_v52, 0.0  ;;  %v357_v54 = vpop.f32.mrf.mxu0 }
  0xd7   : > { %v406_v57 = vpop.f32.mrf.mxu1  ;;  %v477_v58 = vpack.c.bf16 %v461_v51, %v459_v48  ;;  %v443_v22 = vmax.f32 %v357_v54, 0.0 }
  0xd8   : > { %v478_v61 = vpack.c.bf16 %v462_v53, %v460_v49  ;;  %v444_v23 = vmax.f32 %v406_v57, 0.0 }
  0xd9   : > { %484 = vmatpush.bf16.msrb.mxu2 %v477_v58 }
  0xda   : > { %497 = vmatpush.bf16.msrb.mxu3 %v478_v61 }
  0xdd   : > { %485 = vmatpush.bf16.msrb.mxu2 %v475_v0 }
  0xde   : > { %498 = vmatpush.bf16.msrb.mxu3 %v476_v3  ;;  %v359_v4 = vpop.f32.mrf.mxu0 }
  0xdf   : > { %v408_v5 = vpop.f32.mrf.mxu1  ;;  %v445_v18 = vmax.f32 %v359_v4, 0.0 }
  0xe0   : > { %v446_v20 = vmax.f32 %v408_v5, 0.0 }
  0xe1   : > { %486 = vmatpush.bf16.msrb.mxu2 %v473_v6  ;;  %v469_v25 = vpack.c.bf16 %v445_v18, %v443_v22 }
  0xe2   : > { %499 = vmatpush.bf16.msrb.mxu3 %v474_v7  ;;  %v470_v27 = vpack.c.bf16 %v446_v20, %v444_v23 }
  0xe6   : > { %v362_v8 = vpop.f32.mrf.mxu0 }
  0xe7   : > { %v411_v9 = vpop.f32.mrf.mxu1  ;;  %v447_v13 = vmax.f32 %v362_v8, 0.0 }
  0xe8   : > { %v448_v16 = vmax.f32 %v411_v9, 0.0 }
  0xee   : > { %v364_v12 = vpop.f32.mrf.mxu0 }
  0xef   : > { %v449_v14 = vmax.f32 %v364_v12, 0.0  ;;  %v413_v15 = vpop.f32.mrf.mxu1 }
  0xf0   : > { %v450_v17 = vmax.f32 %v413_v15, 0.0 }
  0xf1   : > { %v471_v19 = vpack.c.bf16 %v449_v14, %v447_v13 }
  0xf2   : > { %v472_v21 = vpack.c.bf16 %v450_v17, %v448_v16 }
  0xf3   : > { %487 = vmatpush.bf16.msrb.mxu2 %v471_v19 }
  0xf4   : > { %500 = vmatpush.bf16.msrb.mxu3 %v472_v21 }
  0xf7   : > { %488 = vmatpush.bf16.msrb.mxu2 %v469_v25 }
  0xf8   : > { %501 = vmatpush.bf16.msrb.mxu3 %v470_v27 }
  0xfb   : > { %489 = vmatpush.bf16.msrb.mxu2 %v467_v33 }
  0xfc   : > { %502 = vmatpush.bf16.msrb.mxu3 %v468_v37 }
  0xff   : > { %490 = vmatpush.bf16.msrb.mxu2 %v465_v44 }
 0x100   : > { %503 = vmatpush.bf16.msrb.mxu3 %v466_v42 }
 0x103   : > { %491 = vmatpush.bf16.msrb.mxu2 %v945_v30 }
 0x104   : > { %504 = vmatpush.bf16.msrb.mxu3 %v947_v31 }
 0x106   : > { %492 = vmatmul.bf16.vlgmr.msrb.gmra.mxu2 %v244_v38 }
 0x107   : > { %505 = vmatmul.bf16.vlgmr.msrb.gmra.mxu3 %v244_v38 }
 0x189   : > { %v493_v30 = vpop.f32.mrf.mxu2 }
 0x18a   : > { %v506_v35 = vpop.f32.mrf.mxu3  ;;  %v494_v39 = vadd.f32 %v493_v30, %v482_v34 }
 0x18b   : > { %v507_v43 = vadd.f32 %v506_v35, %v482_v34 }
 0x18c   : > { %510 = vst [vmem:[%s215_s26] sm:$0xff] %v494_v39 }
 0x18d   : > { %511 = vst [vmem:[%s215_s26 + $0x8] sm:$0xff] %v507_v43 }
 0x18e   : > { %765 = shalt.err (!%p762_p5)
}
 0x18f   : > { %680 = dma.vmem_to_hbm [thread:$0]  (%p885_p4), %s529_s29, 256, %s531_s30, %s513_s5  }
 0x191   : > { %v495_v31 = vpop.f32.mrf.mxu2 }
 0x192   : > { %v508_v45 = vpop.f32.mrf.mxu3 }
 0x193 PF: > { %p686_p6 = scmp.ge.s32.totalorder %s816_s20, 2  ;;  %s542_s12 = sand.u32 1, %s796_s15  }
 0x194   : > { %s543_s13 = scalar_lea.sflag [#allocation3], %s542_s12 }
 0x195   : > { %p683_p7 = pnand %p686_p6, %p892_p8 }
 0x197   : > { %p684_p9 = pneg %p683_p7 }
 0x199   : > { %791 = dma.done.wait (%p684_p9), %s543_s13, 256  }
 0x19a   : > { %793 = vsyncadd (%p684_p9), %s543_s13, 4294967040  ;;  %s17_s20 = sadd.s32 1, %s816_s20   ;;  %s1022_s15 = smov %s800_s16 }
 0x19b   : > { %p14_p10 = scmp.ge.s32.totalorder %s17_s20, 4   ;;  %s1023_s16 = smov %s804_s17 }
 0x19c   : > { %s1024_s17 = smov %s898_s28  ;;  %s1025_s18 = smov %s812_s19 }
 0x19d   : > { %s1026_s19 = smov %s1028_s23  ;;  %16 = sbr.rel (!%p14_p10) target bundleno = 4 (0x4), region = 71 }
 0x1a2   :  { %549 = vsyncpa [#allocation3], 1 }
 0x1a3   :  { %551 = vsyncpa [#allocation3 + $0x1], 1 }

</bundles_post_ra>
